<compile_context>
chip_gen: v7x
topology: tpu7x:2x2x1
jax: 0.10.0
libtpu: 0.0.40
codegen_flags: <defaults>
</compile_context>

<pallas_src>
import jax
import jax.numpy as jnp
from jax.experimental import pallas as pl
from jax.experimental.pallas import tpu as pltpu

_EXPAND_DIM = 1024  # hard-coded in the torch module: nn.Linear(m, 1024)


def _round_up(a, b):
    return ((a + b - 1) // b) * b


def _router_mlp_kernel(x_ref, w1_ref, b1_ref, w2_ref, b2_ref, out_ref):
    """Fused expand -> ReLU -> project for one row tile.

    x_ref  : VMEM (tm, m)
    w1_ref : VMEM (m, 1024)       expand weight (transposed vs torch layout)
    b1_ref : VMEM (1, 1024)
    w2_ref : VMEM (1024, E_pad)   project weight (transposed vs torch, lane-padded)
    b2_ref : VMEM (1, E_pad)
    out_ref: VMEM (tm, E_pad)
    """
    # Expand + bias + ReLU, f32 accumulation on the MXU.
    h = jnp.dot(x_ref[...], w1_ref[...], preferred_element_type=jnp.float32)
    h = jnp.maximum(h + b1_ref[...].astype(jnp.float32), 0.0)
    # Project + bias. Cast hidden back to the weight dtype for the MXU feed
    # (no-op for f32 weights), accumulate in f32.
    logits = jnp.dot(h.astype(w2_ref.dtype), w2_ref[...],
                     preferred_element_type=jnp.float32)
    out_ref[...] = (logits + b2_ref[...].astype(jnp.float32)).astype(out_ref.dtype)


def multistep_router_multilayer(x, w1_t, b1, w2_t, b2, *, block_rows=256):
    """x: (..., m); w1_t: (m, 1024); b1: (1024,); w2_t: (1024, E); b2: (E,)."""
    m = x.shape[-1]
    lead = x.shape[:-1]
    hd = w1_t.shape[-1]
    E = w2_t.shape[-1]

    x2 = x.reshape(-1, m)
    n = x2.shape[0]

    # Row tile: as many rows as possible per grid step (capped), sublane-aligned.
    tm = min(block_rows, _round_up(n, 8))
    n_pad = _round_up(n, tm)
    e_pad = _round_up(E, 128)  # lane-dense output store

    if n_pad != n:
        x2 = jnp.pad(x2, ((0, n_pad - n), (0, 0)))
    if e_pad != E:
        w2_t = jnp.pad(w2_t, ((0, 0), (0, e_pad - E)))
        b2 = jnp.pad(b2, (0, e_pad - E))

    b1_2d = b1.reshape(1, hd)
    b2_2d = b2.reshape(1, e_pad)

    grid_spec = pltpu.PrefetchScalarGridSpec(
        num_scalar_prefetch=0,
        grid=(n_pad // tm,),
        in_specs=[
            pl.BlockSpec((tm, m), lambda i: (i, 0)),       # x rows (tiled)
            pl.BlockSpec((m, hd), lambda i: (0, 0)),       # expand W (resident)
            pl.BlockSpec((1, hd), lambda i: (0, 0)),       # expand b (resident)
            pl.BlockSpec((hd, e_pad), lambda i: (0, 0)),   # project W (resident)
            pl.BlockSpec((1, e_pad), lambda i: (0, 0)),    # project b (resident)
        ],
        out_specs=pl.BlockSpec((tm, e_pad), lambda i: (i, 0)),
    )

    itemsize = jnp.dtype(x.dtype).itemsize
    cost = pl.CostEstimate(
        flops=2 * n_pad * m * hd + 2 * n_pad * hd * e_pad,
        transcendentals=0,
        bytes_accessed=(n_pad * m + m * hd + hd + hd * e_pad + e_pad
                        + n_pad * e_pad) * itemsize,
    )

    out = pl.pallas_call(
        _router_mlp_kernel,
        out_shape=jax.ShapeDtypeStruct((n_pad, e_pad), x.dtype),
        grid_spec=grid_spec,
        compiler_params=pltpu.CompilerParams(
            dimension_semantics=("parallel",),
            vmem_limit_bytes=64 * 1024 * 1024,
        ),
        cost_estimate=cost,
    )(x2, w1_t, b1_2d, w2_t, b2_2d)

    return out[:n, :E].reshape(*lead, E)


def multistep_router_forward(x, params, router_type="multi_layer"):
    """Mirrors MultiStepRouter.forward."""
    if router_type == "multi_layer":
        return multistep_router_multilayer(
            x,
            params["expand_w_t"], params["expand_b"],
            params["project_w_t"], params["project_b"],
        )
    if router_type == "attention":
        # TODO(synk): attention router path (nn.MultiheadAttention) not implemented.
        raise NotImplementedError("router_type='attention' not implemented")
    raise ValueError("Invalid router type")


if __name__ == "__main__":
    # Small deterministic shapes consistent with the module's forward:
    # x: (batch=2, seq=8, input_dim=32); expand -> 1024; project -> num_experts=8.
    B, S, M, E = 2, 8, 32, 8

    key = jax.random.PRNGKey(0)
    kx, kw1, kb1, kw2, kb2 = jax.random.split(key, 5)

    x = jax.random.normal(kx, (B, S, M), dtype=jnp.float32)
    # nn.Linear stores weight as (out, in); keep transposed copies for row-major matmuls.
    w1 = jax.random.normal(kw1, (_EXPAND_DIM, M), dtype=jnp.float32) * 0.05
    b1 = jax.random.normal(kb1, (_EXPAND_DIM,), dtype=jnp.float32) * 0.05
    w2 = jax.random.normal(kw2, (E, _EXPAND_DIM), dtype=jnp.float32) * 0.05
    b2 = jax.random.normal(kb2, (E,), dtype=jnp.float32) * 0.05

    params = dict(expand_w_t=w1.T, expand_b=b1, project_w_t=w2.T, project_b=b2)

    out = multistep_router_forward(x, params, router_type="multi_layer")
    out = jax.block_until_ready(out)

    # Pure-JAX reference (matches the torch 'multi_layer' forward).
    h_ref = jnp.maximum(jnp.einsum("bsm,mh->bsh", x, w1.T) + b1, 0.0)
    ref = jnp.einsum("bsh,he->bse", h_ref, w2.T) + b2

    assert out.shape == (B, S, E)
    max_err = float(jnp.max(jnp.abs(out - ref)))
    assert jnp.allclose(out, ref, atol=1e-3, rtol=1e-3), max_err

    print("KERNEL_OK")
</pallas_src>

<mosaic_0001>
module attributes {stable_mosaic.version = 11 : i64} {
  func.func @_router_mlp_kernel(%arg0: i32, %arg1: memref<16x32xf32, #tpu.memory_space<vmem>>, %arg2: memref<32x1024xf32, #tpu.memory_space<vmem>>, %arg3: memref<1x1024xf32, #tpu.memory_space<vmem>>, %arg4: memref<1024x128xf32, #tpu.memory_space<vmem>>, %arg5: memref<1x128xf32, #tpu.memory_space<vmem>>, %arg6: memref<16x128xf32, #tpu.memory_space<vmem>>) attributes {dimension_semantics = [#tpu.dimension_semantics<parallel>], iteration_bounds = array<i64: 1>, scalar_prefetch = 0 : i64, scratch_operands = 0 : i64, tpu.core_type = #tpu.core_type<tc>, window_params = [{transform_indices = @transform_0, window_bounds = array<i64: 16, 32>}, {pipeline_mode = #tpu.pipeline_mode<synchronous>, transform_indices = @transform_1, window_bounds = array<i64: 32, 1024>}, {pipeline_mode = #tpu.pipeline_mode<synchronous>, transform_indices = @transform_2, window_bounds = array<i64: 1, 1024>}, {pipeline_mode = #tpu.pipeline_mode<synchronous>, transform_indices = @transform_3, window_bounds = array<i64: 1024, 128>}, {pipeline_mode = #tpu.pipeline_mode<synchronous>, transform_indices = @transform_4, window_bounds = array<i64: 1, 128>}, {transform_indices = @transform_5, window_bounds = array<i64: 16, 128>}]} {
    %c0 = arith.constant 0 : index
    %c0_0 = arith.constant 0 : index
    %0 = vector.load %arg1[%c0, %c0_0] : memref<16x32xf32, #tpu.memory_space<vmem>>, vector<16x32xf32>
    %c0_1 = arith.constant 0 : index
    %c0_2 = arith.constant 0 : index
    %1 = vector.load %arg2[%c0_1, %c0_2] : memref<32x1024xf32, #tpu.memory_space<vmem>>, vector<32x1024xf32>
    %cst = arith.constant dense<0.000000e+00> : vector<16x1024xf32>
    %2 = tpu.matmul %0, %1, %cst {dimension_numbers = #tpu.dot_dimension_numbers<[1], [0], [0], [1], [0, 0, 1, 1], [], []>} : vector<16x32xf32>, vector<32x1024xf32>, vector<16x1024xf32> -> vector<16x1024xf32>
    %c0_3 = arith.constant 0 : index
    %c0_4 = arith.constant 0 : index
    %3 = vector.load %arg3[%c0_3, %c0_4] : memref<1x1024xf32, #tpu.memory_space<vmem>>, vector<1x1024xf32>
    %4 = vector.broadcast %3 : vector<1x1024xf32> to vector<16x1024xf32>
    %5 = arith.addf %2, %4 : vector<16x1024xf32>
    %cst_5 = arith.constant 0.000000e+00 : f32
    %6 = vector.broadcast %cst_5 : f32 to vector<16x1024xf32>
    %7 = arith.maximumf %5, %6 : vector<16x1024xf32>
    %c0_6 = arith.constant 0 : index
    %c0_7 = arith.constant 0 : index
    %8 = vector.load %arg4[%c0_6, %c0_7] : memref<1024x128xf32, #tpu.memory_space<vmem>>, vector<1024x128xf32>
    %cst_8 = arith.constant dense<0.000000e+00> : vector<16x128xf32>
    %9 = tpu.matmul %7, %8, %cst_8 {dimension_numbers = #tpu.dot_dimension_numbers<[1], [0], [0], [1], [0, 0, 1, 1], [], []>} : vector<16x1024xf32>, vector<1024x128xf32>, vector<16x128xf32> -> vector<16x128xf32>
    %c0_9 = arith.constant 0 : index
    %c0_10 = arith.constant 0 : index
    %10 = vector.load %arg5[%c0_9, %c0_10] : memref<1x128xf32, #tpu.memory_space<vmem>>, vector<1x128xf32>
    %11 = vector.broadcast %10 : vector<1x128xf32> to vector<16x128xf32>
    %12 = arith.addf %9, %11 : vector<16x128xf32>
    %c0_11 = arith.constant 0 : index
    %c0_12 = arith.constant 0 : index
    %13 = vector.load %arg6[%c0_11, %c0_12] : memref<16x128xf32, #tpu.memory_space<vmem>>, vector<16x128xf32>
    tpu.vector_store %arg6[%c0_11, %c0_12], %12 {strides = array<i32>} : memref<16x128xf32, #tpu.memory_space<vmem>>, vector<16x128xf32>,
    return
  }
  func.func @transform_0(%arg0: i32) -> (i32, i32) {
    %c0_i32 = arith.constant 0 : i32
    %c0_i32_0 = arith.constant 0 : i32
    return %arg0, %c0_i32 : i32, i32
  }
  func.func @transform_1(%arg0: i32) -> (i32, i32) {
    %c0_i32 = arith.constant 0 : i32
    %c0_i32_0 = arith.constant 0 : i32
    %c0_i32_1 = arith.constant 0 : i32
    return %c0_i32, %c0_i32_0 : i32, i32
  }
  func.func @transform_2(%arg0: i32) -> (i32, i32) {
    %c0_i32 = arith.constant 0 : i32
    %c0_i32_0 = arith.constant 0 : i32
    %c0_i32_1 = arith.constant 0 : i32
    return %c0_i32, %c0_i32_0 : i32, i32
  }
  func.func @transform_3(%arg0: i32) -> (i32, i32) {
    %c0_i32 = arith.constant 0 : i32
    %c0_i32_0 = arith.constant 0 : i32
    %c0_i32_1 = arith.constant 0 : i32
    return %c0_i32, %c0_i32_0 : i32, i32
  }
  func.func @transform_4(%arg0: i32) -> (i32, i32) {
    %c0_i32 = arith.constant 0 : i32
    %c0_i32_0 = arith.constant 0 : i32
    %c0_i32_1 = arith.constant 0 : i32
    return %c0_i32, %c0_i32_0 : i32, i32
  }
  func.func @transform_5(%arg0: i32) -> (i32, i32) {
    %c0_i32 = arith.constant 0 : i32
    %c0_i32_0 = arith.constant 0 : i32
    return %arg0, %c0_i32 : i32, i32
  }
}

</mosaic_0001>

<bundles_post_ra>
// kernel: tpu_custom_call.1
= control target key start
LH: loop header
LB: loop body
LE: loop exit
PB: predicated region body
PF: predicated region fallthrough
CT: control target
= control target key end

     0   :  { %10 = vsyncpa [#allocation3], 0  ;;  %s1610_s0 = inlined_call_operand.hbm [shape: f32[16,32], index: 0, kind: input, shape index: {}]   ;;  %s1611_s1 = inlined_call_operand.hbm [shape: f32[32,1024], index: 1, kind: input, shape index: {}]   ;;  %s1612_s2 = inlined_call_operand.hbm [shape: f32[1,1024], index: 2, kind: input, shape index: {}]   ;;  %s1613_s3 = inlined_call_operand.hbm [shape: f32[1024,128], index: 3, kind: input, shape index: {}]   ;;  %s1614_s4 = inlined_call_operand.hbm [shape: f32[1,128], index: 4, kind: input, shape index: {}]   ;;  %s1615_s5 = inlined_call_operand.hbm [shape: f32[16,128], index: 5, kind: output, shape index: {}]  }
   0x1   :  { %11 = vsyncpa [#allocation6], 0 }
   0x2   :  { %12 = vsyncpa [#allocation9], 0 }
   0x3   :  { %13 = vsyncpa [#allocation4], 0  ;;  %s1420_s18 = smov [#allocation5]   ;;  %s1280_s22 = scalar_lea.hbm %s1611_s1, 4096 }
   0x4   :  { %s31_s19 = sshll.u32 %s1420_s18, 4  ;;  %p1281_p0 = scmp.ne.s32.totalorder %s1611_s1, %s1280_s22  ;;  %s32_s19 = int_to_ptr.vmem [resolvable:$true] %s31_s19 }
   0x5   :  { %p1284_p1 = scmp.lt.u32.totalorder %s1280_s22, %s1611_s1 }
   0x7   :  { %p1286_p2 = pnand %p1284_p1, %p1281_p0 }
   0x9   :  { %1289 = shalt.err (!%p1286_p2)
}
   0xa   :  { %s1290_s27 = scalar_lea.vmem %s32_s19, 4096  ;;  %p1295_p4 = scmp.lt.s32.totalorder %s32_s19, %s32_s19 }
   0xb   :  { %p1291_p3 = scmp.ne.s32.totalorder %s32_s19, %s1290_s27  ;;  %p1296_p5 = scmp.lt.s32.totalorder %s1290_s27, %s1290_s27 }
   0xd   :  { %p1297_p6 = por %p1296_p5, %p1295_p4 }
   0xf   :  { %p1298_p7 = pnand %p1297_p6, %p1291_p3 }
  0x11   :  { %1301 = shalt.err (!%p1298_p7)
}
  0x12   :  { %s1421_s28 = smov 1024   ;;  %s1422_s29 = smov 64  }
  0x13   :  { %37 = dma.hbm_to_vmem [thread:$0]  %s1611_s1, 4096, %s32_s19, [#allocation6], %s1421_s28, %s1421_s28, %s1422_s29  }
  0x14   :  { %s1423_s7 = smov [#allocation8]   ;;  %s1424_s9 = smov [#allocation2]  }
  0x15   :  { %s53_s8 = sshll.u32 %s1423_s7, 4  ;;  %s19_s10 = sshll.u32 %s1424_s9, 4  ;;  %s54_s8 = int_to_ptr.vmem [resolvable:$true] %s53_s8  ;;  %s20_s10 = int_to_ptr.vmem [resolvable:$true] %s19_s10 }
  0x16   :  { %s1302_s13 = scalar_lea.hbm %s1613_s3, 16384 }
  0x17   :  { %p1303_p8 = scmp.ne.s32.totalorder %s1613_s3, %s1302_s13  ;;  %p1306_p9 = scmp.lt.u32.totalorder %s1302_s13, %s1613_s3 }
  0x19   :  { %p1308_p10 = pnand %p1306_p9, %p1303_p8 }
  0x1b   :  { %1311 = shalt.err (!%p1308_p10)
}
  0x1c   :  { %s1312_s1 = scalar_lea.vmem %s54_s8, 16384  ;;  %p1317_p12 = scmp.lt.s32.totalorder %s54_s8, %s54_s8 }
  0x1d   :  { %p1313_p11 = scmp.ne.s32.totalorder %s54_s8, %s1312_s1  ;;  %p1318_p13 = scmp.lt.s32.totalorder %s1312_s1, %s1312_s1 }
  0x1f   :  { %p1319_p0 = por %p1318_p13, %p1317_p12 }
  0x21   :  { %p1320_p1 = pnand %p1319_p0, %p1313_p11 }
  0x23   :  { %1323 = shalt.err (!%p1320_p1)
}
  0x24   :  { %s1425_s18 = smov 128   ;;  %s1426_s19 = smov 8  }
  0x25   :  { %59 = dma.hbm_to_vmem [thread:$0]  %s1613_s3, 16384, %s54_s8, [#allocation9], %s1425_s18, %s1425_s18, %s1426_s19  }
  0x26   :  { %s1324_s24 = scalar_lea.hbm %s1610_s0, 256 }
  0x27   :  { %p1325_p2 = scmp.ne.s32.totalorder %s1610_s0, %s1324_s24  ;;  %p1328_p3 = scmp.lt.u32.totalorder %s1324_s24, %s1610_s0 }
  0x29   :  { %p1330_p4 = pnand %p1328_p3, %p1325_p2 }
  0x2b   :  { %1333 = shalt.err (!%p1330_p4)
}
  0x2c   :  { %s1334_s29 = scalar_lea.vmem %s20_s10, 256  ;;  %p1339_p6 = scmp.lt.s32.totalorder %s20_s10, %s20_s10 }
  0x2d   :  { %p1335_p5 = scmp.ne.s32.totalorder %s20_s10, %s1334_s29  ;;  %p1340_p7 = scmp.lt.s32.totalorder %s1334_s29, %s1334_s29 }
  0x2f   :  { %p1341_p8 = por %p1340_p7, %p1339_p6 }
  0x31   :  { %p1342_p9 = pnand %p1341_p8, %p1335_p5 }
  0x33   :  { %1345 = shalt.err (!%p1342_p9)
}
  0x34   :  { %25 = dma.hbm_to_vmem [thread:$0]  %s1610_s0, 256, %s20_s10, [#allocation3], %s1425_s18, %s1425_s18, %s1426_s19  }
  0x35   :  { %s1427_s6 = smov [#allocation7]   ;;  %s1428_s8 = smov [#allocation10]  }
  0x36   :  { %s44_s7 = sshll.u32 %s1427_s6, 4  ;;  %s66_s9 = sshll.u32 %s1428_s8, 4  ;;  %s45_s7 = int_to_ptr.vmem [resolvable:$true] %s44_s7  ;;  %s67_s9 = int_to_ptr.vmem [resolvable:$true] %s66_s9 }
  0x37   :  { %s1346_s13 = scalar_lea.hbm %s1612_s2, 128 }
  0x38   :  { %p1347_p10 = scmp.ne.s32.totalorder %s1612_s2, %s1346_s13  ;;  %p1350_p11 = scmp.lt.u32.totalorder %s1346_s13, %s1612_s2 }
  0x3a   :  { %p1352_p12 = pnand %p1350_p11, %p1347_p10 }
  0x3c   :  { %1355 = shalt.err (!%p1352_p12)
}
  0x3d   :  { %s1356_s0 = scalar_lea.vmem %s45_s7, 128  ;;  %p1361_p0 = scmp.lt.s32.totalorder %s45_s7, %s45_s7 }
  0x3e   :  { %p1357_p13 = scmp.ne.s32.totalorder %s45_s7, %s1356_s0  ;;  %p1362_p1 = scmp.lt.s32.totalorder %s1356_s0, %s1356_s0 }
  0x40   :  { %p1363_p2 = por %p1362_p1, %p1361_p0 }
  0x42   :  { %p1364_p3 = pnand %p1363_p2, %p1357_p13 }
  0x44   :  { %1367 = shalt.err (!%p1364_p3)
}
  0x45   :  { %47 = dma.hbm_to_vmem [thread:$0]  %s1612_s2, 128, %s45_s7, [#allocation6]  }
  0x46   :  { %s1368_s22 = scalar_lea.hbm %s1614_s4, 16 }
  0x47   :  { %p1369_p4 = scmp.ne.s32.totalorder %s1614_s4, %s1368_s22  ;;  %p1372_p5 = scmp.lt.u32.totalorder %s1368_s22, %s1614_s4 }
  0x49   :  { %p1374_p6 = pnand %p1372_p5, %p1369_p4 }
  0x4b   :  { %1377 = shalt.err (!%p1374_p6)
}
  0x4c   :  { %s1378_s27 = scalar_lea.vmem %s67_s9, 16  ;;  %s1382_s28 = scalar_lea.vmem %s67_s9, 32 }
  0x4d   :  { %p1379_p7 = scmp.ne.s32.totalorder %s67_s9, %s1378_s27  ;;  %p1383_p8 = scmp.lt.s32.totalorder %s67_s9, %s67_s9 }
  0x4e   :  { %p1384_p9 = scmp.lt.s32.totalorder %s1382_s28, %s1378_s27 }
  0x50   :  { %p1385_p10 = por %p1384_p9, %p1383_p8 }
  0x52   :  { %p1386_p11 = pnand %p1385_p10, %p1379_p7 }
  0x54   :  { %1389 = shalt.err (!%p1386_p11)
}
  0x55   :  { %69 = dma.hbm_to_vmem [thread:$0]  %s1614_s4, 16, %s67_s9, [#allocation9]  }
  0x56   :  { %1412 = dma.done.wait [#allocation3], 256  }
  0x57   :  { %1413 = vsyncadd [#allocation3], 4294967040 }
  0x58   :  { %1414 = dma.done.wait [#allocation6], 4224  }
  0x59   :  { %1415 = vsyncadd [#allocation6], 4294963072 }
  0x5a   :  { %1416 = dma.done.wait [#allocation9], 16400  }
  0x5b   :  { %1417 = vsyncadd [#allocation9], 4294950896  ;;  %v1429_v0 = vmov 0.0   ;;  %v88_v1 = vld [vmem:[#allocation5 + $0x8] sm:$0xff]  ;;  %v90_v3 = vld [vmem:[#allocation5 + $0x18] sm:$0xff]  ;;  %vm161_vm0 = vcmask 261120  }
  0x5c   :  { %232 = vmatprep.mubr.f32.mxu0 %v1429_v0  ;;  %309 = vmatprep.mubr.f32.mxu1 %v1429_v0  ;;  %v96_v2 = vld [vmem:[#allocation5 + $0x48] sm:$0xff]  ;;  %v98_v5 = vld [vmem:[#allocation5 + $0x58] sm:$0xff]  ;;  %v87_v6 = vld [vmem:[#allocation5] sm:$0xff]  ;;  %s1430_s4 = smov [#allocation11]  }
  0x5d   :  { %v1109_v4 = vpack.c.bf16 %v96_v2, %v88_v1  ;;  %v95_v7 = vld [vmem:[#allocation5 + $0x40] sm:$0xff]  ;;  %v1117_v8 = vpack.c.bf16 %v98_v5, %v90_v3  ;;  %v89_v10 = vld [vmem:[#allocation5 + $0x10] sm:$0xff]  ;;  %v104_v12 = vld [vmem:[#allocation5 + $0x88] sm:$0xff]  ;;  %s934_s3 = sshll.u32 %s1430_s4, 4  ;;  %s935_s3 = int_to_ptr.vmem [resolvable:$true] %s934_s3 }
  0x5e   :  { %v1111_v9 = vpack.c.bf16 %v95_v7, %v87_v6  ;;  %v97_v11 = vld [vmem:[#allocation5 + $0x50] sm:$0xff]  ;;  %v112_v14 = vld [vmem:[#allocation5 + $0xc8] sm:$0xff]  ;;  %v106_v15 = vld [vmem:[#allocation5 + $0x98] sm:$0xff]  ;;  %s1390_s30 = scalar_lea.vmem %s935_s3, 256  ;;  %p1395_p13 = scmp.lt.s32.totalorder %s935_s3, %s935_s3 }
  0x5f   :  { %1110 = vmatprep.subr.bf16.mxu0 %v1109_v4  ;;  %v1119_v13 = vpack.c.bf16 %v97_v11, %v89_v10  ;;  %v114_v16 = vld [vmem:[#allocation5 + $0xd8] sm:$0xff]  ;;  %1118 = vmatprep.subr.bf16.mxu1 %v1117_v8  ;;  %v1113_v17 = vpack.c.bf16 %v112_v14, %v104_v12  ;;  %v103_v19 = vld [vmem:[#allocation5 + $0x80] sm:$0xff]  ;;  %v105_v21 = vld [vmem:[#allocation5 + $0x90] sm:$0xff]  ;;  %p1391_p12 = scmp.ne.s32.totalorder %s935_s3, %s1390_s30  ;;  %p1396_p0 = scmp.lt.s32.totalorder %s1390_s30, %s1390_s30 }
  0x60   :  { %1112 = vmatpush1.bf16.msra.mxu0 %v1111_v9  ;;  %v1121_v18 = vpack.c.bf16 %v114_v16, %v106_v15  ;;  %v111_v20 = vld [vmem:[#allocation5 + $0xc0] sm:$0xff]  ;;  %v113_v23 = vld [vmem:[#allocation5 + $0xd0] sm:$0xff]  ;;  %v92_v24 = vld [vmem:[#allocation5 + $0x28] sm:$0xff] }
  0x61   :  { %1120 = vmatpush1.bf16.msra.mxu1 %v1119_v13  ;;  %v1115_v22 = vpack.c.bf16 %v111_v20, %v103_v19  ;;  %1114 = vmatprep.subr.bf16.mxu0 %v1113_v17  ;;  %v1123_v25 = vpack.c.bf16 %v113_v23, %v105_v21  ;;  %v100_v26 = vld [vmem:[#allocation5 + $0x68] sm:$0xff]  ;;  %v91_v27 = vld [vmem:[#allocation5 + $0x20] sm:$0xff]  ;;  %v1529_v29 = vld [vmem:[#allocation2] sm:$0xff]  ;;  %p1397_p1 = por %p1396_p0, %p1395_p13 }
  0x62   :  { %1122 = vmatprep.subr.bf16.mxu1 %v1121_v18  ;;  %v99_v28 = vld [vmem:[#allocation5 + $0x60] sm:$0xff]  ;;  %v1125_v30 = vpack.c.bf16 %v100_v26, %v92_v24  ;;  %v94_v31 = vld [vmem:[#allocation5 + $0x38] sm:$0xff]  ;;  %v93_v34 = vld [vmem:[#allocation5 + $0x30] sm:$0xff] }
  0x63   :  { %v102_v32 = vld [vmem:[#allocation5 + $0x78] sm:$0xff]  ;;  %v101_v35 = vld [vmem:[#allocation5 + $0x70] sm:$0xff]  ;;  %v108_v36 = vld [vmem:[#allocation5 + $0xa8] sm:$0xff]  ;;  %v1127_v37 = vpack.c.bf16 %v99_v28, %v91_v27  ;;  %p1398_p2 = pnand %p1397_p1, %p1391_p12 }
  0x64   :  { %1116 = vmatpush1.bf16.msra.mxu0 %v1115_v22  ;;  %v1133_v33 = vpack.c.bf16 %v102_v32, %v94_v31  ;;  %v1135_v38 = vpack.c.bf16 %v101_v35, %v93_v34  ;;  %v116_v39 = vld [vmem:[#allocation5 + $0xe8] sm:$0xff]  ;;  %v107_v40 = vld [vmem:[#allocation5 + $0xa0] sm:$0xff]  ;;  %v110_v43 = vld [vmem:[#allocation5 + $0xb8] sm:$0xff] }
  0x65   :  { %1124 = vmatpush1.bf16.msra.mxu1 %v1123_v25  ;;  %1126 = vmatprep.subr.bf16.mxu0 %v1125_v30  ;;  %v115_v41 = vld [vmem:[#allocation5 + $0xe0] sm:$0xff]  ;;  %v1129_v42 = vpack.c.bf16 %v116_v39, %v108_v36  ;;  %v118_v44 = vld [vmem:[#allocation5 + $0xf8] sm:$0xff]  ;;  %v109_v45 = vld [vmem:[#allocation5 + $0xb0] sm:$0xff] }
  0x66   :  { %1134 = vmatprep.subr.bf16.mxu1 %v1133_v33  ;;  %v1137_v46 = vpack.c.bf16 %v118_v44, %v110_v43  ;;  %v117_v47 = vld [vmem:[#allocation5 + $0xf0] sm:$0xff]  ;;  %v508_v48 = vld [vmem:[#allocation8 + $0x80] sm:$0xff]  ;;  %v86_v50 = vld [vmem:[#allocation2 + $0x8] sm:$0xff]  ;;  %v1131_v53 = vpack.c.bf16 %v115_v41, %v107_v40 }
  0x67   :  { %948 = vmatmul.mubr.msk.f32.vlgmr.msra.gmra.mrb[0].mxu0 %vm161_vm0, %v1529_v29  ;;  %v509_v49 = vld [vmem:[#allocation8 + $0x88] sm:$0xff]  ;;  %v540_v51 = vld [vmem:[#allocation8 + $0x180] sm:$0xff]  ;;  %v1139_v54 = vpack.c.bf16 %v117_v47, %v109_v45  ;;  %v510_v61 = vld [vmem:[#allocation8 + $0x90] sm:$0xff] }
  0x68   :  { %950 = vmatmul.mubr.msk.f32.vlgmr.msra.gmra.mrb[0].mxu1 %vm161_vm0, %v1529_v29  ;;  %238 = vmatprep.mubr.f32.mxu0 %v1429_v0  ;;  %v541_v52 = vld [vmem:[#allocation8 + $0x188] sm:$0xff]  ;;  %v1141_v55 = vpack.c.bf16 %v509_v49, %v508_v48  ;;  %v492_v56 = vld [vmem:[#allocation8] sm:$0xff]  ;;  %v511_v62 = vld [vmem:[#allocation8 + $0x98] sm:$0xff] }
  0x69   :  { %1128 = vmatpush1.bf16.msra.mxu0 %v1127_v37  ;;  %1136 = vmatpush1.bf16.msra.mxu1 %v1135_v38  ;;  %v493_v57 = vld [vmem:[#allocation8 + $0x8] sm:$0xff]  ;;  %v1173_v58 = vpack.c.bf16 %v541_v52, %v540_v51  ;;  %v524_v59 = vld [vmem:[#allocation8 + $0x100] sm:$0xff]  ;;  %v542_v63 = vld [vmem:[#allocation8 + $0x190] sm:$0xff]  ;;  %v1145_v6 = vpack.c.bf16 %v511_v62, %v510_v61 }
  0x6a   :  { %315 = vmatprep.mubr.f32.mxu1 %v1429_v0  ;;  %1130 = vmatprep.subr.bf16.mxu0 %v1129_v42  ;;  %v525_v60 = vld [vmem:[#allocation8 + $0x108] sm:$0xff]  ;;  %v543_v1 = vld [vmem:[#allocation8 + $0x198] sm:$0xff]  ;;  %v1143_v2 = vpack.c.bf16 %v493_v57, %v492_v56  ;;  %v494_v4 = vld [vmem:[#allocation8 + $0x10] sm:$0xff] }
  0x6b   :  { %949 = vmatmul.mubr.msk.f32.gmra.mrb[2].mxu0 %vm161_vm0, %v86_v50  ;;  %1138 = vmatprep.subr.bf16.mxu1 %v1137_v46  ;;  %v1175_v3 = vpack.c.bf16 %v525_v60, %v524_v59  ;;  %v495_v5 = vld [vmem:[#allocation8 + $0x18] sm:$0xff]  ;;  %v1177_v7 = vpack.c.bf16 %v543_v1, %v542_v63  ;;  %v526_v8 = vld [vmem:[#allocation8 + $0x110] sm:$0xff]  ;;  %v512_v10 = vld [vmem:[#allocation8 + $0xa0] sm:$0xff] }
  0x6c   :  { %951 = vmatmul.mubr.msk.f32.gmra.mrb[2].mxu1 %vm161_vm0, %v86_v50  ;;  %386 = vmatprep.mubr.f32.mxu0 %v1429_v0  ;;  %v527_v9 = vld [vmem:[#allocation8 + $0x118] sm:$0xff]  ;;  %v513_v11 = vld [vmem:[#allocation8 + $0xa8] sm:$0xff]  ;;  %v544_v12 = vld [vmem:[#allocation8 + $0x1a0] sm:$0xff]  ;;  %v1147_v14 = vpack.c.bf16 %v495_v5, %v494_v4 }
  0x6d   :  { %1132 = vmatpush1.bf16.msra.mxu0 %v1131_v53  ;;  %1140 = vmatpush1.bf16.msra.mxu1 %v1139_v54  ;;  %v545_v13 = vld [vmem:[#allocation8 + $0x1a8] sm:$0xff]  ;;  %v1179_v15 = vpack.c.bf16 %v527_v9, %v526_v8  ;;  %v496_v16 = vld [vmem:[#allocation8 + $0x20] sm:$0xff]  ;;  %v1149_v18 = vpack.c.bf16 %v513_v11, %v512_v10  ;;  %v514_v22 = vld [vmem:[#allocation8 + $0xb0] sm:$0xff] }
  0x6e   :  { %463 = vmatprep.mubr.f32.mxu1 %v1429_v0  ;;  %1142 = vmatprep.subr.bf16.mxu0 %v1141_v55  ;;  %v497_v17 = vld [vmem:[#allocation8 + $0x28] sm:$0xff]  ;;  %v1181_v19 = vpack.c.bf16 %v545_v13, %v544_v12  ;;  %v528_v20 = vld [vmem:[#allocation8 + $0x120] sm:$0xff]  ;;  %v515_v23 = vld [vmem:[#allocation8 + $0xb8] sm:$0xff] }
  0x6f   :  { %1174 = vmatprep.subr.bf16.mxu1 %v1173_v58  ;;  %v529_v21 = vld [vmem:[#allocation8 + $0x128] sm:$0xff]  ;;  %v546_v24 = vld [vmem:[#allocation8 + $0x1b0] sm:$0xff]  ;;  %v1151_v25 = vpack.c.bf16 %v497_v17, %v496_v16  ;;  %v499_v28 = vld [vmem:[#allocation8 + $0x38] sm:$0xff] }
  0x70   :  { %952 = vmatmul.mubr.msk.f32.vlgmr.msra.gmra.mrb[4].mxu0 %vm161_vm0, %v1529_v29  ;;  %954 = vmatmul.mubr.msk.f32.vlgmr.msra.gmra.mrb[4].mxu1 %vm161_vm0, %v1529_v29  ;;  %v1183_v26 = vpack.c.bf16 %v529_v21, %v528_v20  ;;  %v498_v27 = vld [vmem:[#allocation8 + $0x30] sm:$0xff]  ;;  %v1153_v29 = vpack.c.bf16 %v515_v23, %v514_v22  ;;  %v531_v32 = vld [vmem:[#allocation8 + $0x138] sm:$0xff]  ;;  %v516_v33 = vld [vmem:[#allocation8 + $0xc0] sm:$0xff] }
  0x71   :  { %392 = vmatprep.mubr.f32.mxu0 %v1429_v0  ;;  %469 = vmatprep.mubr.f32.mxu1 %v1429_v0  ;;  %v547_v0 = vld [vmem:[#allocation8 + $0x1b8] sm:$0xff]  ;;  %v530_v31 = vld [vmem:[#allocation8 + $0x130] sm:$0xff]  ;;  %v517_v34 = vld [vmem:[#allocation8 + $0xc8] sm:$0xff]  ;;  %v1155_v37 = vpack.c.bf16 %v499_v28, %v498_v27 }
  0x72   :  { %1144 = vmatpush3.bf16.msra.mxu0 %v1143_v2  ;;  %1176 = vmatpush3.bf16.msra.mxu1 %v1175_v3  ;;  %v1185_v30 = vpack.c.bf16 %v547_v0, %v546_v24  ;;  %v548_v35 = vld [vmem:[#allocation8 + $0x1c0] sm:$0xff]  ;;  %v549_v36 = vld [vmem:[#allocation8 + $0x1c8] sm:$0xff]  ;;  %v1187_v38 = vpack.c.bf16 %v531_v32, %v530_v31  ;;  %v1157_v41 = vpack.c.bf16 %v517_v34, %v516_v33  ;;  %v518_v45 = vld [vmem:[#allocation8 + $0xd0] sm:$0xff] }
  0x73   :  { %1146 = vmatprep.subr.bf16.mxu0 %v1145_v6  ;;  %1178 = vmatprep.subr.bf16.mxu1 %v1177_v7  ;;  %v500_v39 = vld [vmem:[#allocation8 + $0x40] sm:$0xff]  ;;  %v501_v40 = vld [vmem:[#allocation8 + $0x48] sm:$0xff]  ;;  %v1189_v42 = vpack.c.bf16 %v549_v36, %v548_v35  ;;  %v519_v46 = vld [vmem:[#allocation8 + $0xd8] sm:$0xff] }
  0x74   :  { %953 = vmatmul.mubr.msk.f32.gmra.mrb[6].mxu0 %vm161_vm0, %v86_v50  ;;  %955 = vmatmul.mubr.msk.f32.gmra.mrb[6].mxu1 %vm161_vm0, %v86_v50  ;;  %v532_v43 = vld [vmem:[#allocation8 + $0x140] sm:$0xff]  ;;  %v533_v44 = vld [vmem:[#allocation8 + $0x148] sm:$0xff]  ;;  %v550_v47 = vld [vmem:[#allocation8 + $0x1d0] sm:$0xff]  ;;  %v1159_v49 = vpack.c.bf16 %v501_v40, %v500_v39  ;;  %v1161_v53 = vpack.c.bf16 %v519_v46, %v518_v45 }
  0x75   :  { %v551_v48 = vld [vmem:[#allocation8 + $0x1d8] sm:$0xff]  ;;  %v1191_v50 = vpack.c.bf16 %v533_v44, %v532_v43  ;;  %v502_v51 = vld [vmem:[#allocation8 + $0x50] sm:$0xff]  ;;  %v520_v57 = vld [vmem:[#allocation8 + $0xe0] sm:$0xff] }
  0x76   :  { %1148 = vmatpush3.bf16.msra.mxu0 %v1147_v14  ;;  %1180 = vmatpush3.bf16.msra.mxu1 %v1179_v15  ;;  %v503_v52 = vld [vmem:[#allocation8 + $0x58] sm:$0xff]  ;;  %v1193_v54 = vpack.c.bf16 %v551_v48, %v550_v47  ;;  %v534_v55 = vld [vmem:[#allocation8 + $0x150] sm:$0xff]  ;;  %v521_v58 = vld [vmem:[#allocation8 + $0xe8] sm:$0xff] }
  0x77   :  { %1150 = vmatprep.subr.bf16.mxu0 %v1149_v18  ;;  %1182 = vmatprep.subr.bf16.mxu1 %v1181_v19  ;;  %v535_v56 = vld [vmem:[#allocation8 + $0x158] sm:$0xff]  ;;  %v552_v59 = vld [vmem:[#allocation8 + $0x1e0] sm:$0xff]  ;;  %v553_v60 = vld [vmem:[#allocation8 + $0x1e8] sm:$0xff]  ;;  %v1163_v61 = vpack.c.bf16 %v503_v52, %v502_v51  ;;  %v1165_v1 = vpack.c.bf16 %v521_v58, %v520_v57 }
  0x78   :  { %v1195_v62 = vpack.c.bf16 %v535_v56, %v534_v55  ;;  %v504_v63 = vld [vmem:[#allocation8 + $0x60] sm:$0xff]  ;;  %v1197_v2 = vpack.c.bf16 %v553_v60, %v552_v59  ;;  %v505_v3 = vld [vmem:[#allocation8 + $0x68] sm:$0xff]  ;;  %v522_v8 = vld [vmem:[#allocation8 + $0xf0] sm:$0xff] }
  0x79   :  { %v536_v4 = vld [vmem:[#allocation8 + $0x160] sm:$0xff]  ;;  %v537_v5 = vld [vmem:[#allocation8 + $0x168] sm:$0xff]  ;;  %v1167_v6 = vpack.c.bf16 %v505_v3, %v504_v63  ;;  %v523_v9 = vld [vmem:[#allocation8 + $0xf8] sm:$0xff] }
  0x7a   :  { %1152 = vmatpush3.bf16.msra.mxu0 %v1151_v25  ;;  %1184 = vmatpush3.bf16.msra.mxu1 %v1183_v26  ;;  %v1199_v7 = vpack.c.bf16 %v537_v5, %v536_v4  ;;  %v554_v10 = vld [vmem:[#allocation8 + $0x1f0] sm:$0xff]  ;;  %v1169_v11 = vpack.c.bf16 %v523_v9, %v522_v8  ;;  %v555_v12 = vld [vmem:[#allocation8 + $0x1f8] sm:$0xff]  ;;  %v572_v20 = vld [vmem:[#allocation8 + $0x280] sm:$0xff]  ;;  %v121_v25 = vlaneseq }
  0x7b   :  { %1154 = vmatprep.subr.bf16.mxu0 %v1153_v29  ;;  %1186 = vmatprep.subr.bf16.mxu1 %v1185_v30  ;;  %v506_v13 = vld [vmem:[#allocation8 + $0x70] sm:$0xff]  ;;  %v507_v14 = vld [vmem:[#allocation8 + $0x78] sm:$0xff]  ;;  %v1201_v15 = vpack.c.bf16 %v555_v12, %v554_v10  ;;  %v573_v21 = vld [vmem:[#allocation8 + $0x288] sm:$0xff] }
  0x7c   :  { %v1171_v16 = vpack.c.bf16 %v507_v14, %v506_v13  ;;  %v538_v17 = vld [vmem:[#allocation8 + $0x170] sm:$0xff]  ;;  %v539_v18 = vld [vmem:[#allocation8 + $0x178] sm:$0xff]  ;;  %v604_v22 = vld [vmem:[#allocation8 + $0x380] sm:$0xff]  ;;  %v1205_v23 = vpack.c.bf16 %v573_v21, %v572_v20  ;;  %v1549_v26 = vshrl.u32 %v121_v25, 7 }
  0x7d   :  { %v1203_v19 = vpack.c.bf16 %v539_v18, %v538_v17  ;;  %v605_v24 = vld [vmem:[#allocation8 + $0x388] sm:$0xff]  ;;  %v1552_v28 = vld [vmem:[#allocation7] sm:$0xff]  ;;  %v574_v47 = vld [vmem:[#allocation8 + $0x290] sm:$0xff] }
  0x7e   :  { %1156 = vmatpush3.bf16.msra.mxu0 %v1155_v37  ;;  %1188 = vmatpush3.bf16.msra.mxu1 %v1187_v38  ;;  %v1237_v0 = vpack.c.bf16 %v605_v24, %v604_v22  ;;  %v123_v27 = vsub.s32 0, %v1549_v26  ;;  %v131_v29 = vsub.s32 2, %v1549_v26  ;;  %v127_v30 = vsub.s32 1, %v1549_v26  ;;  %v556_v37 = vld [vmem:[#allocation8 + $0x200] sm:$0xff]  ;;  %v589_v43 = vld [vmem:[#allocation8 + $0x308] sm:$0xff]  ;;  %v575_v48 = vld [vmem:[#allocation8 + $0x298] sm:$0xff] }
  0x7f   :  { %1158 = vmatprep.subr.bf16.mxu0 %v1157_v41  ;;  %1190 = vmatprep.subr.bf16.mxu1 %v1189_v42  ;;  %v135_v31 = vsub.s32 3, %v1549_v26  ;;  %v557_v41 = vld [vmem:[#allocation8 + $0x208] sm:$0xff]  ;;  %v588_v42 = vld [vmem:[#allocation8 + $0x300] sm:$0xff]  ;;  %v607_v51 = vld [vmem:[#allocation8 + $0x398] sm:$0xff]  ;;  %v143_v52 = vsub.s32 5, %v1549_v26 }
  0x80   :  { %v124_v32 = vrot.slane %v1552_v28, %v123_v27  ;;  %v132_v33 = vrot.slane %v1552_v28, %v131_v29  ;;  %v128_v34 = vrot.slane %v1552_v28, %v127_v30  ;;  %v1207_v56 = vpack.c.bf16 %v557_v41, %v556_v37  ;;  %v558_v58 = vld [vmem:[#allocation8 + $0x210] sm:$0xff]  ;;  %v559_v63 = vld [vmem:[#allocation8 + $0x218] sm:$0xff]  ;;  %v577_v8 = vld [vmem:[#allocation8 + $0x2a8] sm:$0xff] }
  0x81   :  { %v136_v35 = vrot.slane %v1552_v28, %v135_v31  ;;  %v1239_v57 = vpack.c.bf16 %v589_v43, %v588_v42  ;;  %v608_v12 = vld [vmem:[#allocation8 + $0x3a0] sm:$0xff]  ;;  %v609_v13 = vld [vmem:[#allocation8 + $0x3a8] sm:$0xff]  ;;  %v1211_v18 = vpack.c.bf16 %v559_v63, %v558_v58  ;;  %v611_v37 = vld [vmem:[#allocation8 + $0x3b8] sm:$0xff] }
  0x82   :  { %1160 = vmatpush3.bf16.msra.mxu0 %v1159_v49  ;;  %1192 = vmatpush3.bf16.msra.mxu1 %v1191_v50  ;;  %v606_v50 = vld [vmem:[#allocation8 + $0x390] sm:$0xff]  ;;  %v561_v24 = vld [vmem:[#allocation8 + $0x228] sm:$0xff]  ;;  %v1245_v30 = vpack.c.bf16 %v609_v13, %v608_v12  ;;  %v596_v63 = vld [vmem:[#allocation8 + $0x340] sm:$0xff] }
  0x83   :  { %1162 = vmatprep.subr.bf16.mxu0 %v1161_v53  ;;  %1194 = vmatprep.subr.bf16.mxu1 %v1193_v54  ;;  %v151_v53 = vsub.s32 7, %v1549_v26  ;;  %v1241_v5 = vpack.c.bf16 %v607_v51, %v606_v50  ;;  %v593_v31 = vld [vmem:[#allocation8 + $0x328] sm:$0xff]  ;;  %v562_v41 = vld [vmem:[#allocation8 + $0x230] sm:$0xff]  ;;  %v595_v51 = vld [vmem:[#allocation8 + $0x338] sm:$0xff] }
  0x84   :  { %v598_v12 = vld [vmem:[#allocation8 + $0x350] sm:$0xff] }
  0x85   :  { %v1567_v17 = vrot.slane %v1552_v28, %v151_v53  ;;  %v581_v53 = vld [vmem:[#allocation8 + $0x2c8] sm:$0xff] }
  0x86   :  { %1164 = vmatpush3.bf16.msra.mxu0 %v1163_v61  ;;  %1196 = vmatpush3.bf16.msra.mxu1 %v1195_v62  ;;  %v1209_v62 = vpack.c.bf16 %v575_v48, %v574_v47 }
  0x87   :  { %1166 = vmatprep.subr.bf16.mxu0 %v1165_v1  ;;  %1198 = vmatprep.subr.bf16.mxu1 %v1197_v2  ;;  %v590_v1 = vld [vmem:[#allocation8 + $0x310] sm:$0xff] }
  0x8a   :  { %1168 = vmatpush3.bf16.msra.mxu0 %v1167_v6  ;;  %1200 = vmatpush3.bf16.msra.mxu1 %v1199_v7  ;;  %v591_v6 = vld [vmem:[#allocation8 + $0x318] sm:$0xff]  ;;  %v576_v7 = vld [vmem:[#allocation8 + $0x2a0] sm:$0xff] }
  0x8b   :  { %1170 = vmatprep.subr.bf16.mxu0 %v1169_v11  ;;  %1202 = vmatprep.subr.bf16.mxu1 %v1201_v15  ;;  %v1243_v21 = vpack.c.bf16 %v591_v6, %v590_v1  ;;  %v1213_v22 = vpack.c.bf16 %v577_v8, %v576_v7  ;;  %v615_v6 = vld [vmem:[#allocation8 + $0x3d8] sm:$0xff] }
  0x8e   :  { %1172 = vmatpush3.bf16.msra.mxu0 %v1171_v16  ;;  %1204 = vmatpush3.bf16.msra.mxu1 %v1203_v19  ;;  %v1564_v16 = vrot.slane %v1552_v28, %v143_v52  ;;  %v580_v52 = vld [vmem:[#allocation8 + $0x2c0] sm:$0xff] }
  0x8f   :  { %1206 = vmatprep.subr.bf16.mxu0 %v1205_v23  ;;  %1238 = vmatprep.subr.bf16.mxu1 %v1237_v0  ;;  %v560_v23 = vld [vmem:[#allocation8 + $0x220] sm:$0xff] }
  0x90   :  { %v592_v0 = vld [vmem:[#allocation8 + $0x320] sm:$0xff] }
  0x91   :  { %v1247_v42 = vpack.c.bf16 %v593_v31, %v592_v0  ;;  %v600_v31 = vld [vmem:[#allocation8 + $0x360] sm:$0xff] }
 0x13a   :  { %v234_v36 = vpop.f32.mrb[0].mxu0 }
 0x13b   :  { %v235_v38 = vadd.f32 %v234_v36, %v124_v32  ;;  %v311_v39 = vpop.f32.mrb[0].mxu1  ;;  %v236_v40 = vpop.f32.mrb[1].mxu0  ;;  %v610_v36 = vld [vmem:[#allocation8 + $0x3b0] sm:$0xff] }
 0x13c   :  { %v312_v44 = vadd.f32 %v311_v39, %v132_v33  ;;  %v237_v45 = vadd.f32 %v236_v40, %v128_v34  ;;  %v313_v46 = vpop.f32.mrb[1].mxu1  ;;  %v1215_v40 = vpack.c.bf16 %v561_v24, %v560_v23  ;;  %v1249_v50 = vpack.c.bf16 %v611_v37, %v610_v36  ;;  %v618_v36 = vld [vmem:[#allocation8 + $0x3f0] sm:$0xff]  ;;  %v619_v37 = vld [vmem:[#allocation8 + $0x3f8] sm:$0xff] }
 0x13d   :  { %v314_v49 = vadd.f32 %v313_v46, %v136_v35  ;;  %v476_v60 = vmax.f32 %v235_v38, 0.0  ;;  %v139_v24 = vsub.s32 4, %v1549_v26 }
 0x13e   :  { %v478_v54 = vmax.f32 %v312_v44, 0.0  ;;  %v477_v55 = vmax.f32 %v237_v45, 0.0  ;;  %v240_v59 = vpop.f32.mrb[2].mxu0  ;;  %v563_v44 = vld [vmem:[#allocation8 + $0x238] sm:$0xff]  ;;  %v594_v45 = vld [vmem:[#allocation8 + $0x330] sm:$0xff] }
 0x13f   :  { %v479_v61 = vmax.f32 %v314_v49, 0.0  ;;  %v241_v2 = vadd.f32 %v240_v59, %v124_v32  ;;  %v242_v3 = vpop.f32.mrb[3].mxu0  ;;  %v317_v4 = vpop.f32.mrb[2].mxu1  ;;  %v578_v32 = vld [vmem:[#allocation8 + $0x2b0] sm:$0xff]  ;;  %v1219_v58 = vpack.c.bf16 %v563_v44, %v562_v41  ;;  %v1251_v59 = vpack.c.bf16 %v595_v51, %v594_v45 }
 0x140   :  { %691 = vmatprep.mubr.f32.mxu0 %v477_v55  ;;  %v243_v9 = vadd.f32 %v242_v3, %v128_v34  ;;  %v318_v10 = vadd.f32 %v317_v4, %v132_v33  ;;  %v319_v11 = vpop.f32.mrb[3].mxu1  ;;  %v579_v33 = vld [vmem:[#allocation8 + $0x2b8] sm:$0xff]  ;;  %v582_v3 = vld [vmem:[#allocation8 + $0x2d0] sm:$0xff]  ;;  %v1265_v44 = vpack.c.bf16 %v619_v37, %v618_v36 }
 0x141   :  { %766 = vmatprep.mubr.f32.mxu1 %v479_v61  ;;  %692 = vmatmul.mubr.f32.vlgmr.msra.gmra.mrb[8].mxu0 %v476_v60  ;;  %v484_v14 = vmax.f32 %v241_v2, 0.0  ;;  %v320_v15 = vadd.f32 %v319_v11, %v136_v35  ;;  %v1217_v43 = vpack.c.bf16 %v579_v33, %v578_v32  ;;  %v1221_v60 = vpack.c.bf16 %v581_v53, %v580_v52  ;;  %v564_v61 = vld [vmem:[#allocation8 + $0x240] sm:$0xff]  ;;  %v597_v2 = vld [vmem:[#allocation8 + $0x348] sm:$0xff]  ;;  %v583_v4 = vld [vmem:[#allocation8 + $0x2d8] sm:$0xff] }
 0x142   :  { %767 = vmatmul.mubr.f32.vlgmr.msra.gmra.mrb[8].mxu1 %v478_v54  ;;  %1208 = vmatpush3.bf16.msra.mxu0 %v1207_v56  ;;  %v485_v19 = vmax.f32 %v243_v9, 0.0  ;;  %v486_v20 = vmax.f32 %v318_v10, 0.0  ;;  %v612_v56 = vld [vmem:[#allocation8 + $0x3c0] sm:$0xff]  ;;  %v1255_v8 = vpack.c.bf16 %v597_v2, %v596_v63  ;;  %v1225_v9 = vpack.c.bf16 %v583_v4, %v582_v3  ;;  %v566_v10 = vld [vmem:[#allocation8 + $0x250] sm:$0xff]  ;;  %v567_v11 = vld [vmem:[#allocation8 + $0x258] sm:$0xff] }
 0x143   :  { %1240 = vmatpush3.bf16.msra.mxu1 %v1239_v57  ;;  %1210 = vmatprep.subr.bf16.mxu0 %v1209_v62  ;;  %v487_v25 = vmax.f32 %v320_v15, 0.0  ;;  %v1569_v27 = vpop.f32.mrb[4].mxu0  ;;  %v1571_v29 = vpop.f32.mrb[4].mxu1  ;;  %v613_v57 = vld [vmem:[#allocation8 + $0x3c8] sm:$0xff]  ;;  %v584_v15 = vld [vmem:[#allocation8 + $0x2e0] sm:$0xff]  ;;  %v602_v45 = vld [vmem:[#allocation8 + $0x370] sm:$0xff] }
 0x144   :  { %1242 = vmatprep.subr.bf16.mxu1 %v1241_v5  ;;  %696 = vmatprep.mubr.f32.mxu0 %v485_v19  ;;  %v390_v34 = vpop.f32.mrb[5].mxu0  ;;  %v467_v35 = vpop.f32.mrb[5].mxu1  ;;  %v565_v62 = vld [vmem:[#allocation8 + $0x248] sm:$0xff]  ;;  %v1253_v1 = vpack.c.bf16 %v613_v57, %v612_v56  ;;  %v614_v5 = vld [vmem:[#allocation8 + $0x3d0] sm:$0xff]  ;;  %v616_v19 = vld [vmem:[#allocation8 + $0x3e0] sm:$0xff] }
 0x145   :  { %v391_v38 = vadd.f32 %v390_v34, %v1564_v16  ;;  %697 = vmatmul.mubr.f32.gmra.mrb[10].mxu0 %v484_v14  ;;  %v468_v39 = vadd.f32 %v467_v35, %v1567_v17  ;;  %771 = vmatprep.mubr.f32.mxu1 %v487_v25  ;;  %v1223_v7 = vpack.c.bf16 %v565_v62, %v564_v61  ;;  %v599_v14 = vld [vmem:[#allocation8 + $0x358] sm:$0xff]  ;;  %v568_v25 = vld [vmem:[#allocation8 + $0x260] sm:$0xff]  ;;  %v601_v33 = vld [vmem:[#allocation8 + $0x368] sm:$0xff] }
 0x146   :  { %1212 = vmatpush3.bf16.msra.mxu0 %v1211_v18  ;;  %772 = vmatmul.mubr.f32.gmra.mrb[10].mxu1 %v486_v20  ;;  %v1257_v13 = vpack.c.bf16 %v615_v6, %v614_v5  ;;  %v585_v18 = vld [vmem:[#allocation8 + $0x2e8] sm:$0xff]  ;;  %v1259_v23 = vpack.c.bf16 %v599_v14, %v598_v12  ;;  %v586_v34 = vld [vmem:[#allocation8 + $0x2f0] sm:$0xff]  ;;  %v587_v35 = vld [vmem:[#allocation8 + $0x2f8] sm:$0xff] }
 0x147   :  { %1244 = vmatpush3.bf16.msra.mxu1 %v1243_v21  ;;  %1214 = vmatprep.subr.bf16.mxu0 %v1213_v22  ;;  %v481_v46 = vmax.f32 %v391_v38, 0.0  ;;  %v483_v47 = vmax.f32 %v468_v39, 0.0  ;;  %v1575_v48 = vpop.f32.mrb[6].mxu0  ;;  %v1577_v49 = vpop.f32.mrb[6].mxu1  ;;  %v617_v20 = vld [vmem:[#allocation8 + $0x3e8] sm:$0xff]  ;;  %v1227_v21 = vpack.c.bf16 %v567_v11, %v566_v10  ;;  %v147_v22 = vsub.s32 6, %v1549_v26 }
 0x148   :  { %1246 = vmatprep.subr.bf16.mxu1 %v1245_v30  ;;  %v1579_v54 = vpop.f32.mrb[7].mxu0  ;;  %v1581_v55 = vpop.f32.mrb[7].mxu1  ;;  %v1229_v0 = vpack.c.bf16 %v585_v18, %v584_v15  ;;  %v569_v30 = vld [vmem:[#allocation8 + $0x268] sm:$0xff]  ;;  %v1261_v32 = vpack.c.bf16 %v617_v20, %v616_v19  ;;  %v1263_v26 = vpack.c.bf16 %v601_v33, %v600_v31  ;;  %v1233_v41 = vpack.c.bf16 %v587_v35, %v586_v34 }
 0x149   :  { %841 = vmatprep.mubr.f32.mxu0 %v481_v46  ;;  %916 = vmatprep.mubr.f32.mxu1 %v483_v47  ;;  %v148_v38 = vrot.slane %v1552_v28, %v147_v22  ;;  %v1231_v39 = vpack.c.bf16 %v569_v30, %v568_v25  ;;  %v603_v46 = vld [vmem:[#allocation8 + $0x378] sm:$0xff]  ;;  %v474_v53 = vadd.f32 %v1581_v55, %v1567_v17 }
 0x14a   :  { %1216 = vmatpush3.bf16.msra.mxu0 %v1215_v40  ;;  %v140_v40 = vrot.slane %v1552_v28, %v139_v24  ;;  %v1267_v28 = vpack.c.bf16 %v603_v46, %v602_v45 }
 0x14b   :  { %1248 = vmatpush3.bf16.msra.mxu1 %v1247_v42  ;;  %1218 = vmatprep.subr.bf16.mxu0 %v1217_v43  ;;  %v570_v42 = vld [vmem:[#allocation8 + $0x270] sm:$0xff]  ;;  %v571_v43 = vld [vmem:[#allocation8 + $0x278] sm:$0xff]  ;;  %v466_v47 = vadd.f32 %v1571_v29, %v148_v38 }
 0x14c   :  { %1250 = vmatprep.subr.bf16.mxu1 %v1249_v50  ;;  %v397_v50 = vadd.f32 %v1579_v54, %v1564_v16  ;;  %v1235_v51 = vpack.c.bf16 %v571_v43, %v570_v42  ;;  %v389_v52 = vadd.f32 %v1569_v27, %v140_v40  ;;  %v491_v16 = vmax.f32 %v474_v53, 0.0 }
 0x14d   :  { %v482_v56 = vmax.f32 %v466_v47, 0.0 }
 0x14e   :  { %1220 = vmatpush3.bf16.msra.mxu0 %v1219_v58  ;;  %v489_v57 = vmax.f32 %v397_v50, 0.0  ;;  %v472_v58 = vadd.f32 %v1577_v49, %v148_v38  ;;  %v480_v29 = vmax.f32 %v389_v52, 0.0 }
 0x14f   :  { %1252 = vmatpush3.bf16.msra.mxu1 %v1251_v59  ;;  %1222 = vmatprep.subr.bf16.mxu0 %v1221_v60  ;;  %v395_v59 = vadd.f32 %v1575_v48, %v140_v40  ;;  %v956_v60 = vld [vmem:[#allocation10] ss:$0 sm:$0xff] }
 0x150   :  { %1254 = vmatprep.subr.bf16.mxu1 %v1253_v1  ;;  %v490_v54 = vmax.f32 %v472_v58, 0.0 }
 0x151   :  { %v488_v27 = vmax.f32 %v395_v59, 0.0 }
 0x152   :  { %1224 = vmatpush3.bf16.msra.mxu0 %v1223_v7 }
 0x153   :  { %1256 = vmatpush3.bf16.msra.mxu1 %v1255_v8  ;;  %1226 = vmatprep.subr.bf16.mxu0 %v1225_v9 }
 0x154   :  { %1258 = vmatprep.subr.bf16.mxu1 %v1257_v13 }
 0x156   :  { %1228 = vmatpush3.bf16.msra.mxu0 %v1227_v21 }
 0x157   :  { %1260 = vmatpush3.bf16.msra.mxu1 %v1259_v23  ;;  %1230 = vmatprep.subr.bf16.mxu0 %v1229_v0 }
 0x158   :  { %1262 = vmatprep.subr.bf16.mxu1 %v1261_v32 }
 0x15a   :  { %1232 = vmatpush3.bf16.msra.mxu0 %v1231_v39 }
 0x15b   :  { %1264 = vmatpush3.bf16.msra.mxu1 %v1263_v26  ;;  %1234 = vmatprep.subr.bf16.mxu0 %v1233_v41 }
 0x15c   :  { %1266 = vmatprep.subr.bf16.mxu1 %v1265_v44 }
 0x15e   :  { %1236 = vmatpush3.bf16.msra.mxu0 %v1235_v51 }
 0x15f   :  { %1268 = vmatpush3.bf16.msra.mxu1 %v1267_v28 }
 0x161   :  { %842 = vmatmul.mubr.f32.vlgmr.msra.gmra.mrb[12].mxu0 %v480_v29 }
 0x162   :  { %917 = vmatmul.mubr.f32.vlgmr.msra.gmra.mrb[12].mxu1 %v482_v56  ;;  %846 = vmatprep.mubr.f32.mxu0 %v489_v57 }
 0x163   :  { %921 = vmatprep.mubr.f32.mxu1 %v491_v16 }
 0x165   :  { %847 = vmatmul.mubr.f32.gmra.mrb[14].mxu0 %v488_v27 }
 0x166   :  { %922 = vmatmul.mubr.f32.gmra.mrb[14].mxu1 %v490_v54 }
 0x214   :  { %v989_v17 = vpop.f32.mrb[8].mxu0 }
 0x215   :  { %v1027_v55 = vpop.f32.mrb[8].mxu1  ;;  %v990_v61 = vpop.f32.mrb[9].mxu0 }
 0x216   :  { %v991_v62 = vadd.f32 %v990_v61, %v989_v17  ;;  %v1028_v49 = vpop.f32.mrb[9].mxu1 }
 0x217   :  { %v1029_v63 = vadd.f32 %v1028_v49, %v1027_v55 }
 0x218   :  { %v694_v1 = vadd.f32 %v991_v62, %v956_v60  ;;  %v992_v2 = vpop.f32.mrb[10].mxu0 }
 0x219   :  { %v993_v48 = vpop.f32.mrb[11].mxu0  ;;  %v1030_v3 = vpop.f32.mrb[10].mxu1 }
 0x21a   :  { %v769_v4 = vadd.f32 %v1029_v63, %v694_v1  ;;  %v994_v5 = vadd.f32 %v993_v48, %v992_v2  ;;  %v1031_v6 = vpop.f32.mrb[11].mxu1 }
 0x21b   :  { %v1032_v7 = vadd.f32 %v1031_v6, %v1030_v3 }
 0x21c   :  { %v699_v8 = vadd.f32 %v994_v5, %v956_v60 }
 0x21e   :  { %v774_v9 = vadd.f32 %v1032_v7, %v699_v8 }
 0x234   :  { %v1065_v10 = vpop.f32.mrb[12].mxu0 }
 0x235   :  { %v1103_v11 = vpop.f32.mrb[12].mxu1  ;;  %v1066_v12 = vpop.f32.mrb[13].mxu0 }
 0x236   :  { %v1067_v13 = vadd.f32 %v1066_v12, %v1065_v10  ;;  %v1104_v14 = vpop.f32.mrb[13].mxu1 }
 0x237   :  { %v1105_v15 = vadd.f32 %v1104_v14, %v1103_v11 }
 0x238   :  { %v844_v18 = vadd.f32 %v1067_v13, %v769_v4  ;;  %v1068_v19 = vpop.f32.mrb[14].mxu0 }
 0x239   :  { %v1106_v20 = vpop.f32.mrb[14].mxu1  ;;  %v1069_v21 = vpop.f32.mrb[15].mxu0 }
 0x23a   :  { %v919_v22 = vadd.f32 %v1105_v15, %v844_v18  ;;  %v1070_v23 = vadd.f32 %v1069_v21, %v1068_v19  ;;  %v1107_v24 = vpop.f32.mrb[15].mxu1 }
 0x23b   :  { %v1108_v0 = vadd.f32 %v1107_v24, %v1106_v20 }
 0x23c   :  { %927 = vst [vmem:[#allocation11] sm:$0xff] %v919_v22  ;;  %v849_v25 = vadd.f32 %v1070_v23, %v774_v9 }
 0x23e   :  { %v924_v30 = vadd.f32 %v1108_v0, %v849_v25 }
 0x240   :  { %928 = vst [vmem:[#allocation11 + $0x8] sm:$0xff] %v924_v30 }
 0x241   :  { %1401 = shalt.err (!%p1398_p2)
}
 0x242   :  { %s1402_s8 = scalar_lea.hbm %s1615_s5, 256 }
 0x243   :  { %p1403_p3 = scmp.ne.s32.totalorder %s1615_s5, %s1402_s8  ;;  %p1406_p4 = scmp.lt.u32.totalorder %s1402_s8, %s1615_s5 }
 0x245   :  { %p1408_p5 = pnand %p1406_p4, %p1403_p3 }
 0x247   :  { %1411 = shalt.err (!%p1408_p5)
}
 0x248   :  { %940 = dma.vmem_to_hbm [thread:$0]  %s935_s3, 256, %s1615_s5, [#allocation4], %s1425_s18, %s1425_s18, %s1426_s19  }
 0x249   :  { %1418 = dma.done.wait [#allocation4], 256  }
 0x24a   :  { %1419 = vsyncadd [#allocation4], 4294967040 }
 0x24b   :  { %944 = vsyncpa [#allocation3], 1 }
 0x24c   :  { %945 = vsyncpa [#allocation6], 1 }
 0x24d   :  { %946 = vsyncpa [#allocation9], 1 }
 0x24e   :  { %947 = vsyncpa [#allocation4], 1 }

</bundles_post_ra>
